<compile_context>
chip_gen: v7x
topology: tpu7x:2x2x1
jax: 0.10.0
libtpu: 0.0.40
codegen_flags: <defaults>
</compile_context>

<pallas_src>
import functools

import jax
import jax.numpy as jnp
from jax.experimental import pallas as pl
from jax.experimental.pallas import tpu as pltpu


def _wmse_kernel(wcol_ref, x_ref, t_ref, o_ref, acc_ref, *, n_total, tn, inv_mn):
    """Per N-tile: accumulate per-row sums of (x-t)^2; finalize with the weight dot."""
    i = pl.program_id(0)

    @pl.when(i == 0)
    def _init():
        acc_ref[...] = jnp.zeros_like(acc_ref)

    # (K, tn) elementwise squared error on the VPU, accumulated in f32.
    diff = x_ref[...].astype(jnp.float32) - t_ref[...].astype(jnp.float32)
    sq = diff * diff

    # Mask padded lanes of the last (possibly partial) N tile.  Dropped at trace
    # time when N divides evenly into tiles.
    if n_total % tn != 0:
        col = i * tn + jax.lax.broadcasted_iota(jnp.int32, sq.shape, 1)
        sq = jnp.where(col < n_total, sq, jnp.float32(0.0))

    # Per-k partial row sums over this N tile (XLU lane reduction), accumulated in a
    # (K, 1) f32 VMEM scratch that persists across the whole grid.
    acc_ref[...] += jnp.sum(sq, axis=1, keepdims=True)

    @pl.when(i == pl.num_programs(0) - 1)
    def _finalize():
        # sum_k colsum_W[k] * rowsum_S[k], scaled by 1/(M*N).
        total = jnp.sum(wcol_ref[...] * acc_ref[...])
        o_ref[0, 0] = total * jnp.float32(inv_mn)


def _round_up(x, m):
    return ((x + m - 1) // m) * m


def weighted_mse_loss(inputs, targets, weights, *, tn=None,
                      vmem_budget_bytes=8 * 1024 * 1024):
    """inputs, targets: (K, N); weights: (M, K). Returns scalar f32 loss."""
    K, N = inputs.shape
    M, K2 = weights.shape
    assert K == K2, "weights inner dim must match inputs leading dim"

    # Reduce weights over M outside the kernel: only a (K, 1) vector is DMA'd.
    wcol = jnp.sum(weights.astype(jnp.float32), axis=0).reshape(K, 1)

    itemsize = max(jnp.dtype(inputs.dtype).itemsize, jnp.dtype(targets.dtype).itemsize)

    # Lane-tile width over N: a multiple of 128, as large as the VMEM budget allows
    # (2 streamed arrays x 2 double-buffers of (K, tn)), capped at 2048, never
    # larger than N rounded up to a full lane group.
    if tn is None:
        per_lane_bytes = max(4 * K * itemsize, 1)
        tn = (vmem_budget_bytes // per_lane_bytes) // 128 * 128
        tn = max(128, min(tn, 2048, _round_up(N, 128)))

    num_tiles = pl.cdiv(N, tn)
    inv_mn = 1.0 / float(M * N)

    kernel = functools.partial(_wmse_kernel, n_total=N, tn=tn, inv_mn=inv_mn)

    out = pl.pallas_call(
        kernel,
        out_shape=jax.ShapeDtypeStruct((1, 1), jnp.float32),
        grid_spec=pltpu.PrefetchScalarGridSpec(
            num_scalar_prefetch=0,
            grid=(num_tiles,),
            in_specs=[
                pl.BlockSpec((K, 1), lambda i: (0, 0)),    # colsum of weights (resident)
                pl.BlockSpec((K, tn), lambda i: (0, i)),   # inputs N-tile
                pl.BlockSpec((K, tn), lambda i: (0, i)),   # targets N-tile
            ],
            out_specs=pl.BlockSpec(memory_space=pltpu.MemorySpace.SMEM),
            scratch_shapes=[pltpu.VMEM((K, 1), jnp.float32)],
        ),
        compiler_params=pltpu.CompilerParams(
            dimension_semantics=("arbitrary",),            # carried reduction axis
            vmem_limit_bytes=32 * 1024 * 1024,
        ),
        cost_estimate=pl.CostEstimate(
            flops=3 * K * N + 2 * K,
            transcendentals=0,
            bytes_accessed=2 * K * N * itemsize + K * 4 + 4,
        ),
    )(wcol, inputs, targets)
    # TODO(synk): on v7x, add a leading "parallel" grid axis with per-chunk partial
    # outputs so both TensorCores split the N stream; single-core is optimal on v5e/v6e.
    return out[0, 0]


if __name__ == "__main__":
    key = jax.random.PRNGKey(0)
    k_in, k_tg, k_w = jax.random.split(key, 3)

    K, N, M = 32, 128, 8
    inputs = jax.random.normal(k_in, (K, N), dtype=jnp.float32)
    targets = jax.random.normal(k_tg, (K, N), dtype=jnp.float32)
    weights = jax.random.normal(k_w, (M, K), dtype=jnp.float32)

    loss = jax.block_until_ready(weighted_mse_loss(inputs, targets, weights))

    # Pure-JAX reference with the exact torch semantics.
    ref = jnp.mean(jnp.matmul(weights, (inputs - targets) ** 2))
    assert jnp.allclose(loss, ref, rtol=1e-4, atol=1e-5), (loss, ref)

    print("KERNEL_OK")
</pallas_src>

<mosaic_0001>
module attributes {stable_mosaic.version = 11 : i64} {
  func.func @_wmse_kernel(%arg0: i32, %arg1: memref<32x1xf32, #tpu.memory_space<vmem>>, %arg2: memref<32x128xf32, #tpu.memory_space<vmem>>, %arg3: memref<32x128xf32, #tpu.memory_space<vmem>>, %arg4: memref<1x1xf32, #tpu.memory_space<smem>>, %arg5: memref<32x1xf32, #tpu.memory_space<vmem>>) attributes {dimension_semantics = [#tpu.dimension_semantics<arbitrary>], iteration_bounds = array<i64: 1>, scalar_prefetch = 0 : i64, scratch_operands = 1 : i64, tpu.core_type = #tpu.core_type<tc>, window_params = [{pipeline_mode = #tpu.pipeline_mode<synchronous>, transform_indices = @transform_0, window_bounds = array<i64: 32, 1>}, {transform_indices = @transform_1, window_bounds = array<i64: 32, 128>}, {transform_indices = @transform_2, window_bounds = array<i64: 32, 128>}, {transform_indices = @transform_3, window_bounds = array<i64: 1, 1>}]} {
    %c0_i32 = arith.constant 0 : i32
    %0 = arith.cmpi eq, %arg0, %c0_i32 : i32
    %1 = arith.extui %0 : i1 to i32
    %c0_i32_0 = arith.constant 0 : i32
    %2 = arith.cmpi ne, %1, %c0_i32_0 : i32
    scf.if %2 {
      %cst_10 = arith.constant 0.000000e+00 : f32
      %15 = vector.broadcast %cst_10 : f32 to vector<32x1xf32>
      %c0_11 = arith.constant 0 : index
      %c0_12 = arith.constant 0 : index
      %16 = vector.load %arg5[%c0_11, %c0_12] : memref<32x1xf32, #tpu.memory_space<vmem>>, vector<32x1xf32>
      tpu.vector_store %arg5[%c0_11, %c0_12], %15 {strides = array<i32>} : memref<32x1xf32, #tpu.memory_space<vmem>>, vector<32x1xf32>,
    } else {
    }
    %c0 = arith.constant 0 : index
    %c0_1 = arith.constant 0 : index
    %3 = vector.load %arg2[%c0, %c0_1] : memref<32x128xf32, #tpu.memory_space<vmem>>, vector<32x128xf32>
    %c0_2 = arith.constant 0 : index
    %c0_3 = arith.constant 0 : index
    %4 = vector.load %arg3[%c0_2, %c0_3] : memref<32x128xf32, #tpu.memory_space<vmem>>, vector<32x128xf32>
    %5 = arith.subf %3, %4 : vector<32x128xf32>
    %6 = arith.mulf %5, %5 : vector<32x128xf32>
    %c0_4 = arith.constant 0 : index
    %c0_5 = arith.constant 0 : index
    %7 = vector.load %arg5[%c0_4, %c0_5] : memref<32x1xf32, #tpu.memory_space<vmem>>, vector<32x1xf32>
    %cst = arith.constant dense<0.000000e+00> : vector<32xf32>
    %8 = vector.multi_reduction <add>, %6, %cst [1] : vector<32x128xf32> to vector<32xf32>
    %9 = vector.shape_cast %8 : vector<32xf32> to vector<32x1xf32>
    %10 = arith.addf %7, %9 : vector<32x1xf32>
    %c0_6 = arith.constant 0 : index
    %c0_7 = arith.constant 0 : index
    %11 = vector.load %arg5[%c0_6, %c0_7] : memref<32x1xf32, #tpu.memory_space<vmem>>, vector<32x1xf32>
    tpu.vector_store %arg5[%c0_6, %c0_7], %10 {strides = array<i32>} : memref<32x1xf32, #tpu.memory_space<vmem>>, vector<32x1xf32>,
    %c0_i32_8 = arith.constant 0 : i32
    %12 = arith.cmpi eq, %arg0, %c0_i32_8 : i32
    %13 = arith.extui %12 : i1 to i32
    %c0_i32_9 = arith.constant 0 : i32
    %14 = arith.cmpi ne, %13, %c0_i32_9 : i32
    scf.if %14 {
      %c0_10 = arith.constant 0 : index
      %c0_11 = arith.constant 0 : index
      %15 = vector.load %arg1[%c0_10, %c0_11] : memref<32x1xf32, #tpu.memory_space<vmem>>, vector<32x1xf32>
      %c0_12 = arith.constant 0 : index
      %c0_13 = arith.constant 0 : index
      %16 = vector.load %arg5[%c0_12, %c0_13] : memref<32x1xf32, #tpu.memory_space<vmem>>, vector<32x1xf32>
      %17 = arith.mulf %15, %16 : vector<32x1xf32>
      %18 = vector.shape_cast %17 : vector<32x1xf32> to vector<1x32x1xf32>
      %cst_14 = arith.constant dense<0.000000e+00> : vector<1xf32>
      %19 = vector.multi_reduction <add>, %18, %cst_14 [1, 2] : vector<1x32x1xf32> to vector<1xf32>
      %20 = vector.shape_cast %19 : vector<1xf32> to vector<1x1x1xf32>
      %21 = vector.extract %20[0, 0, 0] : f32 from vector<1x1x1xf32>
      %cst_15 = arith.constant 9.765625E-4 : f32
      %22 = arith.mulf %21, %cst_15 : f32
      %c0_16 = arith.constant 0 : index
      %c0_17 = arith.constant 0 : index
      %23 = memref.load %arg4[%c0_16, %c0_17] : memref<1x1xf32, #tpu.memory_space<smem>>
      memref.store %22, %arg4[%c0_16, %c0_17] : memref<1x1xf32, #tpu.memory_space<smem>>
    } else {
    }
    return
  }
  func.func @transform_0(%arg0: i32) -> (i32, i32) {
    %c0_i32 = arith.constant 0 : i32
    %c0_i32_0 = arith.constant 0 : i32
    %c0_i32_1 = arith.constant 0 : i32
    return %c0_i32, %c0_i32_0 : i32, i32
  }
  func.func @transform_1(%arg0: i32) -> (i32, i32) {
    %c0_i32 = arith.constant 0 : i32
    %c0_i32_0 = arith.constant 0 : i32
    return %c0_i32, %arg0 : i32, i32
  }
  func.func @transform_2(%arg0: i32) -> (i32, i32) {
    %c0_i32 = arith.constant 0 : i32
    %c0_i32_0 = arith.constant 0 : i32
    return %c0_i32, %arg0 : i32, i32
  }
  func.func @transform_3(%arg0: i32) -> (i32, i32) {
    %c0_i32 = arith.constant 0 : i32
    %c0_i32_0 = arith.constant 0 : i32
    %c0_i32_1 = arith.constant 0 : i32
    return %c0_i32, %c0_i32_0 : i32, i32
  }
}

</mosaic_0001>

<bundles_post_ra>
// kernel: tpu_custom_call.1
= control target key start
LH: loop header
LB: loop body
LE: loop exit
PB: predicated region body
PF: predicated region fallthrough
CT: control target
= control target key end

     0   :  { %8 = vsyncpa [#allocation4], 0  ;;  %s251_s0 = inlined_call_operand.vmem [shape: f32[32,1], index: 0, kind: input, shape index: {}]   ;;  %s252_s1 = inlined_call_operand.vmem [shape: f32[32,128], index: 1, kind: input, shape index: {}]   ;;  %s253_s2 = inlined_call_operand.hbm [shape: f32[32,128], index: 2, kind: input, shape index: {}]   ;;  %s254_s3 = inlined_call_operand.hbm [shape: f32[1,1], index: 3, kind: output, shape index: {}]  }
   0x1   :  { %9 = vsyncpa [#allocation5], 0  ;;  %s166_s12 = smov [#allocation3]   ;;  %s130_s16 = scalar_lea.hbm %s253_s2, 512 }
   0x2   :  { %s19_s13 = sshll.u32 %s166_s12, 4  ;;  %p131_p0 = scmp.ne.s32.totalorder %s253_s2, %s130_s16  ;;  %s20_s13 = int_to_ptr.vmem [resolvable:$true] %s19_s13 }
   0x3   :  { %p134_p1 = scmp.lt.u32.totalorder %s130_s16, %s253_s2 }
   0x5   :  { %p136_p2 = pnand %p134_p1, %p131_p0 }
   0x7   :  { %139 = shalt.err (!%p136_p2)
}
   0x8   :  { %s140_s21 = scalar_lea.vmem %s20_s13, 512  ;;  %p145_p4 = scmp.lt.s32.totalorder %s20_s13, %s20_s13 }
   0x9   :  { %p141_p3 = scmp.ne.s32.totalorder %s20_s13, %s140_s21  ;;  %p146_p5 = scmp.lt.s32.totalorder %s140_s21, %s140_s21 }
   0xb   :  { %p147_p6 = por %p146_p5, %p145_p4 }
   0xd   :  { %p148_p7 = pnand %p147_p6, %p141_p3 }
   0xf   :  { %151 = shalt.err (!%p148_p7)
}
  0x10   :  { %s167_s22 = smov 128   ;;  %s168_s23 = smov 8  }
  0x11   :  { %25 = dma.hbm_to_vmem [thread:$0]  %s253_s2, 512, %s20_s13, [#allocation4], %s167_s22, %s167_s22, %s168_s23  }
  0x12   :  { %162 = dma.done.wait [#allocation4], 512  }
  0x13   :  { %163 = vsyncadd [#allocation4], 4294966784  ;;  %vm33_vm0 = vcmask 7168   ;;  %v169_v0 = vmov 0.0   ;;  %v38_v1 = vld [vmem:[%s252_s1] sm:$0xff]  ;;  %v40_v3 = vld [vmem:[%s252_s1 + $0x10] sm:$0xff] }
  0x14   :  { %34 = vst.msk [vmem:[#allocation2] sm:$0xff] %vm33_vm0, %v169_v0  ;;  %35 = vst.msk [vmem:[#allocation2 + $0x8] sm:$0xff] %vm33_vm0, %v169_v0  ;;  %v42_v2 = vld [vmem:[#allocation3] sm:$0xff]  ;;  %v44_v5 = vld [vmem:[#allocation3 + $0x10] sm:$0xff]  ;;  %s152_s16 = scalar_lea.hbm %s254_s3, 16 }
  0x15   :  { %36 = vst.msk [vmem:[#allocation2 + $0x10] sm:$0xff] %vm33_vm0, %v169_v0  ;;  %37 = vst.msk [vmem:[#allocation2 + $0x18] sm:$0xff] %vm33_vm0, %v169_v0  ;;  %v46_v4 = vsub.f32 %v38_v1, %v42_v2  ;;  %v39_v6 = vld [vmem:[%s252_s1 + $0x8] sm:$0xff]  ;;  %v48_v8 = vsub.f32 %v40_v3, %v44_v5  ;;  %v41_v10 = vld [vmem:[%s252_s1 + $0x18] sm:$0xff]  ;;  %p153_p8 = scmp.ne.s32.totalorder %s254_s3, %s152_s16  ;;  %p156_p9 = scmp.lt.u32.totalorder %s152_s16, %s254_s3 }
  0x16   :  { %v43_v7 = vld [vmem:[#allocation3 + $0x8] sm:$0xff]  ;;  %v45_v11 = vld [vmem:[#allocation3 + $0x18] sm:$0xff]  ;;  %v78_v29 = vld [vmem:[%s251_s0] sm:$0xff] }
  0x17   :  { %v47_v9 = vsub.f32 %v39_v6, %v43_v7  ;;  %v50_v12 = vmul.f32 %v46_v4, %v46_v4  ;;  %v49_v13 = vsub.f32 %v41_v10, %v45_v11  ;;  %v52_v14 = vmul.f32 %v48_v8, %v48_v8  ;;  %v79_v31 = vld [vmem:[%s251_s0 + $0x8] sm:$0xff]  ;;  %v80_v32 = vld [vmem:[%s251_s0 + $0x10] sm:$0xff]  ;;  %v81_v34 = vld [vmem:[%s251_s0 + $0x18] sm:$0xff]  ;;  %p158_p10 = pnand %p156_p9, %p153_p8 }
  0x19   :  { %58 = vadd.xlane.f32.xlu0 %v50_v12  ;;  %v51_v15 = vmul.f32 %v47_v9, %v47_v9  ;;  %62 = vadd.xlane.f32.xlu1 %v52_v14  ;;  %v53_v16 = vmul.f32 %v49_v13, %v49_v13 }
  0x1b   :  { %v54_v17 = vld [vmem:[#allocation2] sm:$0xff]  ;;  %v55_v23 = vld [vmem:[#allocation2 + $0x8] sm:$0xff] }
  0x1c   :  { %v56_v18 = vld [vmem:[#allocation2 + $0x10] sm:$0xff]  ;;  %v57_v24 = vld [vmem:[#allocation2 + $0x18] sm:$0xff] }
  0x1d   :  { %60 = vadd.xlane.f32.xlu0 %v51_v15  ;;  %64 = vadd.xlane.f32.xlu1 %v53_v16 }
  0xa6   :  { %v59_v19 = vpop.xlane.xlu0 %58  ;;  %v63_v21 = vpop.xlane.xlu1 %62 }
  0xa7   :  { %v66_v20 = vadd.f32 %v59_v19, %v54_v17  ;;  %v68_v22 = vadd.f32 %v63_v21, %v56_v18 }
  0xa9   :  { %71 = vst.msk [vmem:[#allocation2] sm:$0xff] %vm33_vm0, %v66_v20  ;;  %73 = vst.msk [vmem:[#allocation2 + $0x10] sm:$0xff] %vm33_vm0, %v68_v22 }
  0xaa   :  { %v61_v25 = vpop.xlane.xlu0 %60  ;;  %v65_v27 = vpop.xlane.xlu1 %64 }
  0xab   :  { %v67_v26 = vadd.f32 %v61_v25, %v55_v23  ;;  %v69_v28 = vadd.f32 %v65_v27, %v57_v24 }
  0xad   :  { %72 = vst.msk [vmem:[#allocation2 + $0x8] sm:$0xff] %vm33_vm0, %v67_v26  ;;  %74 = vst.msk [vmem:[#allocation2 + $0x18] sm:$0xff] %vm33_vm0, %v69_v28 }
  0xb0   :  { %v82_v30 = vld [vmem:[#allocation2] sm:$0xff]  ;;  %v84_v33 = vld [vmem:[#allocation2 + $0x10] sm:$0xff] }
  0xb1   :  { %v86_v35 = vmul.f32 %v82_v30, %v78_v29  ;;  %v88_v39 = vmul.f32 %v84_v33, %v80_v32 }
  0xb3   :  { %v90_v41 = vsel %vm33_vm0, %v86_v35, 0.0  ;;  %v93_v44 = vsel %vm33_vm0, %v88_v39, 0.0 }
  0xb4   :  { %v83_v36 = vld [vmem:[#allocation2 + $0x8] sm:$0xff]  ;;  %v85_v37 = vld [vmem:[#allocation2 + $0x18] sm:$0xff] }
  0xb5   :  { %v87_v38 = vmul.f32 %v83_v36, %v79_v31  ;;  %v89_v40 = vmul.f32 %v85_v37, %v81_v34 }
  0xb7   :  { %v91_v42 = vsel %vm33_vm0, %v87_v38, 0.0  ;;  %v95_v45 = vsel %vm33_vm0, %v89_v40, 0.0 }
  0xb8   :  { %v92_v43 = vadd.f32 %v91_v42, %v90_v41 }
  0xba   :  { %v94_v46 = vadd.f32 %v93_v44, %v92_v43 }
  0xbc   :  { %v96_v47 = vadd.f32 %v95_v45, %v94_v46 }
  0xbe   :  { %97 = vadd.xlane.f32.xlu0 %v96_v47 }
 0x14b   :  { %v98_v48 = vpop.xlane.xlu0 %97 }
 0x14c   :  { %v99_v49 = vrot.slane %v98_v48, 4 }
 0x14e   :  { %v100_v50 = vadd.f32 %v99_v49, %v98_v48 }
 0x150   :  { %v101_v51 = vrot.slane %v100_v50, 2 }
 0x152   :  { %v102_v52 = vadd.f32 %v101_v51, %v100_v50 }
 0x154   :  { %v103_v53 = vrot.slane %v102_v52, 1 }
 0x156   :  { %v104_v54 = vadd.f32 %v103_v53, %v102_v52 }
 0x158   :  { %123 = vpush %v104_v54 }
 0x189   :  { %s124_s0 = spop %123 }
 0x18a   :  { %s106_s13 = smul.f32 0.0009765625, %s124_s0 }
 0x18c   :  { %108 = sst [smem:[#allocation6]] %s106_s13 }
 0x18d   :  { %161 = shalt.err (!%p158_p10)
}
 0x18e   :  { %s170_s21 = smov [#allocation6]  }
 0x18f   :  { %116 = dma.smem_to_hbm %s170_s21, 16, %s254_s3, [#allocation5]  }
 0x190   :  { %164 = dma.done.wait [#allocation5], 16  }
 0x191   :  { %165 = vsyncadd [#allocation5], 4294967280 }
 0x192   :  { %120 = sfence }
 0x193   :  { %121 = vsyncpa [#allocation4], 1 }
 0x194   :  { %122 = vsyncpa [#allocation5], 1 }

</bundles_post_ra>
